<compile_context>
chip_gen: v5e
topology: v5e:2x2
jax: 0.10.0
libtpu: 0.0.40
codegen_flags: <defaults>
</compile_context>

<pallas_src>
import jax
import jax.numpy as jnp
from jax.experimental import pallas as pl
from jax.experimental.pallas import tpu as pltpu

HIDDEN = 256


def _round_up(x, m):
    return (x + m - 1) // m * m


def _generator_kernel(x_ref, w1_ref, b1_ref, w2_ref, b2_ref, o_ref):
    # Layer 1: bf16 operands on the MXU, f32 accumulation; bias/ReLU in f32.
    h = jnp.dot(x_ref[...].astype(jnp.bfloat16), w1_ref[...],
                preferred_element_type=jnp.float32)
    h = jnp.maximum(h + b1_ref[...], 0.0)          # (TB,H) + (1,H) broadcast
    # Layer 2 + Tanh (tanh goes to the EUP, stays f32).
    y = jnp.dot(h.astype(jnp.bfloat16), w2_ref[...],
                preferred_element_type=jnp.float32)
    y = y + b2_ref[...]                            # (TB,Dp) + (1,Dp) broadcast
    o_ref[...] = jnp.tanh(y).astype(o_ref.dtype)


def generator_forward(x, w1, b1, w2, b2, *, tile_b=512):
    """Fused MLP forward: tanh(relu(x @ w1 + b1) @ w2 + b2).

    x : (B, Z) float32
    w1: (Z, H),  b1: (1, H) or (H,)
    w2: (H, D),  b2: (1, D) or (D,)
    Weights are stored transposed vs. PyTorch so the kernel computes x @ W.
    """
    B, Z = x.shape
    H = w1.shape[1]
    D = w2.shape[1]
    assert w1.shape == (Z, H) and w2.shape == (H, D)

    # Pad feature dims to lane width (128); pad batch to the tile size.
    Zp = _round_up(Z, 128)
    Dp = _round_up(D, 128)
    tb = min(tile_b, _round_up(B, 8))      # small batches -> single small tile
    Bp = _round_up(B, tb)

    xp = jnp.pad(x, ((0, Bp - B), (0, Zp - Z))) if (Bp != B or Zp != Z) else x
    w1p = jnp.pad(w1, ((0, Zp - Z), (0, 0))).astype(jnp.bfloat16)
    w2p = jnp.pad(w2, ((0, 0), (0, Dp - D))).astype(jnp.bfloat16)
    b1p = jnp.reshape(b1, (1, H)).astype(jnp.float32)
    b2p = jnp.pad(jnp.reshape(b2, (1, D)), ((0, 0), (0, Dp - D))).astype(jnp.float32)

    out = pl.pallas_call(
        _generator_kernel,
        out_shape=jax.ShapeDtypeStruct((Bp, Dp), x.dtype),
        grid=(Bp // tb,),
        in_specs=[
            pl.BlockSpec((tb, Zp), lambda i: (i, 0)),   # x tile (pipelined)
            pl.BlockSpec((Zp, H), lambda i: (0, 0)),    # weights stay resident
            pl.BlockSpec((1, H), lambda i: (0, 0)),
            pl.BlockSpec((H, Dp), lambda i: (0, 0)),
            pl.BlockSpec((1, Dp), lambda i: (0, 0)),
        ],
        out_specs=pl.BlockSpec((tb, Dp), lambda i: (i, 0)),
        compiler_params=pltpu.CompilerParams(
            dimension_semantics=("parallel",),
            vmem_limit_bytes=16 << 20,
        ),
    )(xp, w1p, b1p, w2p, b2p)
    return out[:B, :D]


def init_generator_params(key, z_dim, img_dim, hidden=HIDDEN, dtype=jnp.float32):
    """Deterministic init matching PyTorch nn.Linear's U(-1/sqrt(in), 1/sqrt(in))."""
    k1, k2, k3, k4 = jax.random.split(key, 4)
    lim1 = 1.0 / jnp.sqrt(z_dim)
    lim2 = 1.0 / jnp.sqrt(hidden)
    w1 = jax.random.uniform(k1, (z_dim, hidden), dtype, -lim1, lim1)
    b1 = jax.random.uniform(k2, (1, hidden), dtype, -lim1, lim1)
    w2 = jax.random.uniform(k3, (hidden, img_dim), dtype, -lim2, lim2)
    b2 = jax.random.uniform(k4, (1, img_dim), dtype, -lim2, lim2)
    return w1, b1, w2, b2


if __name__ == "__main__":
    key = jax.random.PRNGKey(0)
    k_x, k_p = jax.random.split(key)

    B, Z_DIM, IMG_DIM = 8, 32, 64   # small shapes consistent with the module
    x = jax.random.normal(k_x, (B, Z_DIM), dtype=jnp.float32)
    w1, b1, w2, b2 = init_generator_params(k_p, Z_DIM, IMG_DIM)

    out = generator_forward(x, w1, b1, w2, b2)
    out = jax.block_until_ready(out)

    # Reference in plain f32 JAX (same math as the PyTorch module). Tolerance
    # relaxed because the kernel uses bf16 MXU operands (f32 accumulation).
    ref = jnp.tanh(jnp.maximum(x @ w1 + b1, 0.0) @ w2 + b2)
    assert out.shape == (B, IMG_DIM)
    assert jnp.allclose(out, ref, atol=2e-2, rtol=2e-2), (
        float(jnp.max(jnp.abs(out - ref))))

    print("KERNEL_OK")
</pallas_src>

<mosaic_0001>
module attributes {stable_mosaic.version = 11 : i64} {
  func.func @_generator_kernel(%arg0: i32, %arg1: memref<8x128xf32, #tpu.memory_space<vmem>>, %arg2: memref<128x256xbf16, #tpu.memory_space<vmem>>, %arg3: memref<1x256xf32, #tpu.memory_space<vmem>>, %arg4: memref<256x128xbf16, #tpu.memory_space<vmem>>, %arg5: memref<1x128xf32, #tpu.memory_space<vmem>>, %arg6: memref<8x128xf32, #tpu.memory_space<vmem>>) attributes {dimension_semantics = [#tpu.dimension_semantics<parallel>], iteration_bounds = array<i64: 1>, scalar_prefetch = 0 : i64, scratch_operands = 0 : i64, tpu.core_type = #tpu.core_type<tc>, window_params = [{transform_indices = @transform_0, window_bounds = array<i64: 8, 128>}, {pipeline_mode = #tpu.pipeline_mode<synchronous>, transform_indices = @transform_1, window_bounds = array<i64: 128, 256>}, {pipeline_mode = #tpu.pipeline_mode<synchronous>, transform_indices = @transform_2, window_bounds = array<i64: 1, 256>}, {pipeline_mode = #tpu.pipeline_mode<synchronous>, transform_indices = @transform_3, window_bounds = array<i64: 256, 128>}, {pipeline_mode = #tpu.pipeline_mode<synchronous>, transform_indices = @transform_4, window_bounds = array<i64: 1, 128>}, {transform_indices = @transform_5, window_bounds = array<i64: 8, 128>}]} {
    %c0 = arith.constant 0 : index
    %c0_0 = arith.constant 0 : index
    %0 = vector.load %arg1[%c0, %c0_0] : memref<8x128xf32, #tpu.memory_space<vmem>>, vector<8x128xf32>
    %1 = arith.truncf %0 : vector<8x128xf32> to vector<8x128xbf16>
    %c0_1 = arith.constant 0 : index
    %c0_2 = arith.constant 0 : index
    %2 = vector.load %arg2[%c0_1, %c0_2] : memref<128x256xbf16, #tpu.memory_space<vmem>>, vector<128x256xbf16>
    %cst = arith.constant dense<0.000000e+00> : vector<8x256xf32>
    %3 = tpu.matmul %1, %2, %cst {dimension_numbers = #tpu.dot_dimension_numbers<[1], [0], [0], [1], [0, 0, 1, 1], [], []>} : vector<8x128xbf16>, vector<128x256xbf16>, vector<8x256xf32> -> vector<8x256xf32>
    %c0_3 = arith.constant 0 : index
    %c0_4 = arith.constant 0 : index
    %4 = vector.load %arg3[%c0_3, %c0_4] : memref<1x256xf32, #tpu.memory_space<vmem>>, vector<1x256xf32>
    %5 = vector.broadcast %4 : vector<1x256xf32> to vector<8x256xf32>
    %6 = arith.addf %3, %5 : vector<8x256xf32>
    %cst_5 = arith.constant 0.000000e+00 : f32
    %7 = vector.broadcast %cst_5 : f32 to vector<8x256xf32>
    %8 = arith.maximumf %6, %7 : vector<8x256xf32>
    %9 = arith.truncf %8 : vector<8x256xf32> to vector<8x256xbf16>
    %c0_6 = arith.constant 0 : index
    %c0_7 = arith.constant 0 : index
    %10 = vector.load %arg4[%c0_6, %c0_7] : memref<256x128xbf16, #tpu.memory_space<vmem>>, vector<256x128xbf16>
    %cst_8 = arith.constant dense<0.000000e+00> : vector<8x128xf32>
    %11 = tpu.matmul %9, %10, %cst_8 {dimension_numbers = #tpu.dot_dimension_numbers<[1], [0], [0], [1], [0, 0, 1, 1], [], []>} : vector<8x256xbf16>, vector<256x128xbf16>, vector<8x128xf32> -> vector<8x128xf32>
    %c0_9 = arith.constant 0 : index
    %c0_10 = arith.constant 0 : index
    %12 = vector.load %arg5[%c0_9, %c0_10] : memref<1x128xf32, #tpu.memory_space<vmem>>, vector<1x128xf32>
    %13 = vector.broadcast %12 : vector<1x128xf32> to vector<8x128xf32>
    %14 = arith.addf %11, %13 : vector<8x128xf32>
    %15 = math.tanh %14 : vector<8x128xf32>
    %c0_11 = arith.constant 0 : index
    %c0_12 = arith.constant 0 : index
    %16 = vector.load %arg6[%c0_11, %c0_12] : memref<8x128xf32, #tpu.memory_space<vmem>>, vector<8x128xf32>
    tpu.vector_store %arg6[%c0_11, %c0_12], %15 {strides = array<i32>} : memref<8x128xf32, #tpu.memory_space<vmem>>, vector<8x128xf32>,
    return
  }
  func.func @transform_0(%arg0: i32) -> (i32, i32) {
    %c0_i32 = arith.constant 0 : i32
    %c0_i32_0 = arith.constant 0 : i32
    return %arg0, %c0_i32 : i32, i32
  }
  func.func @transform_1(%arg0: i32) -> (i32, i32) {
    %c0_i32 = arith.constant 0 : i32
    %c0_i32_0 = arith.constant 0 : i32
    %c0_i32_1 = arith.constant 0 : i32
    return %c0_i32, %c0_i32_0 : i32, i32
  }
  func.func @transform_2(%arg0: i32) -> (i32, i32) {
    %c0_i32 = arith.constant 0 : i32
    %c0_i32_0 = arith.constant 0 : i32
    %c0_i32_1 = arith.constant 0 : i32
    return %c0_i32, %c0_i32_0 : i32, i32
  }
  func.func @transform_3(%arg0: i32) -> (i32, i32) {
    %c0_i32 = arith.constant 0 : i32
    %c0_i32_0 = arith.constant 0 : i32
    %c0_i32_1 = arith.constant 0 : i32
    return %c0_i32, %c0_i32_0 : i32, i32
  }
  func.func @transform_4(%arg0: i32) -> (i32, i32) {
    %c0_i32 = arith.constant 0 : i32
    %c0_i32_0 = arith.constant 0 : i32
    %c0_i32_1 = arith.constant 0 : i32
    return %c0_i32, %c0_i32_0 : i32, i32
  }
  func.func @transform_5(%arg0: i32) -> (i32, i32) {
    %c0_i32 = arith.constant 0 : i32
    %c0_i32_0 = arith.constant 0 : i32
    return %arg0, %c0_i32 : i32, i32
  }
}

</mosaic_0001>

<bundles_post_ra>
// kernel: tpu_custom_call.1
= control target key start
LH: loop header
LB: loop body
LE: loop exit
PB: predicated region body
PF: predicated region fallthrough
CT: control target
= control target key end

     0   :  { %10 = vsyncpa [#allocation3], 0  ;;  %s750_s0 = inlined_call_operand.hbm [shape: f32[8,128], index: 0, kind: input, shape index: {}]   ;;  %s751_s1 = inlined_call_operand.hbm [shape: bf16[128,256], index: 1, kind: input, shape index: {}]   ;;  %s752_s2 = inlined_call_operand.hbm [shape: f32[1,256], index: 2, kind: input, shape index: {}]   ;;  %s753_s3 = inlined_call_operand.hbm [shape: bf16[256,128], index: 3, kind: input, shape index: {}]   ;;  %s754_s4 = inlined_call_operand.vmem [shape: f32[1,128], index: 4, kind: input, shape index: {}]   ;;  %s755_s5 = inlined_call_operand.hbm [shape: f32[8,128], index: 5, kind: output, shape index: {}]  }
   0x1   :  { %11 = vsyncpa [#allocation6], 0 }
   0x2   :  { %12 = vsyncpa [#allocation9], 0  ;;  %s29_s20 = sshll.u32 %s751_s1, 4  ;;  %s30_s20 = int_to_ptr.hbm [resolvable:$true] %s29_s20 }
   0x3   :  { %13 = vsyncpa [#allocation4], 0  ;;  %s693_s21 = smov [#allocation5]   ;;  %s19_s25 = sshll.u32 %s750_s0, 4  ;;  %s20_s25 = int_to_ptr.hbm [resolvable:$true] %s19_s25 }
   0x4   :  { %s31_s22 = sshll.u32 %s693_s21, 4  ;;  %s694_s26 = smov 128   ;;  %s32_s22 = int_to_ptr.vmem [resolvable:$true] %s31_s22 }
   0x5   :  { %s695_s27 = smov 8   ;;  %s696_s28 = smov [#allocation2]  }
   0x6   :  { %37 = dma.hbm_to_vmem [thread:$0]  %s30_s20, 2048, %s32_s22, [#allocation6], %s694_s26, %s694_s26, %s695_s27  }
   0x7   :  { %s21_s29 = sshll.u32 %s696_s28, 4  ;;  %s43_s7 = sshll.u32 %s752_s2, 4  ;;  %s22_s29 = int_to_ptr.vmem [resolvable:$true] %s21_s29  ;;  %s44_s7 = int_to_ptr.hbm [resolvable:$true] %s43_s7 }
   0x8   :  { %24 = dma.hbm_to_vmem [thread:$0]  %s20_s25, 128, %s22_s29, [#allocation3]  }
   0x9   :  { %s53_s9 = sshll.u32 %s753_s3, 4  ;;  %s697_s10 = smov [#allocation7]   ;;  %s54_s9 = int_to_ptr.hbm [resolvable:$true] %s53_s9 }
   0xa   :  { %s45_s11 = sshll.u32 %s697_s10, 4  ;;  %s698_s0 = smov [#allocation8]   ;;  %s46_s11 = int_to_ptr.vmem [resolvable:$true] %s45_s11 }
   0xb   :  { %48 = dma.hbm_to_vmem [thread:$0]  %s44_s7, 32, %s46_s11, [#allocation6]  }
   0xc   :  { %s55_s12 = sshll.u32 %s698_s0, 4  ;;  %s699_s13 = smov 64   ;;  %s56_s12 = int_to_ptr.vmem [resolvable:$true] %s55_s12 }
   0xd   :  { %s700_s14 = smov 4  }
   0xe   :  { %61 = dma.hbm_to_vmem [thread:$0]  %s54_s9, 2048, %s56_s12, [#allocation9], %s699_s13, %s699_s13, %s700_s14  }
   0xf   :  { %685 = dma.done.wait [#allocation3], 128  }
  0x10   :  { %686 = vsyncadd [#allocation3], 4294967168 }
  0x11   :  { %687 = dma.done.wait [#allocation6], 2080  }
  0x12   :  { %688 = vsyncadd [#allocation6], 4294965216 }
  0x13   :  { %689 = dma.done.wait [#allocation9], 2048  }
  0x14   :  { %690 = vsyncadd [#allocation9], 4294965248  ;;  %v451_v0 = vld [vmem:[#allocation5 + $0x70] sm:$0xf]  ;;  %v536_v1 = vld [vmem:[#allocation5 + $0x74] sm:$0xf0] }
  0x15   :  { %v535_v2 = vld [vmem:[#allocation5 + $0x74] sm:$0xf]  ;;  %v452_v3 = vor.u32 %v536_v1, %v451_v0  ;;  %v453_v4 = vld [vmem:[#allocation5 + $0x78] sm:$0xf0]  ;;  %v443_v5 = vld [vmem:[#allocation5 + $0x60] sm:$0xf] }
  0x16   :  { %v534_v6 = vld [vmem:[#allocation5 + $0x64] sm:$0xf0]  ;;  %v456_v7 = vor.u32 %v535_v2, %v453_v4  ;;  %v533_v8 = vld [vmem:[#allocation5 + $0x64] sm:$0xf]  ;;  %v445_v9 = vld [vmem:[#allocation5 + $0x68] sm:$0xf0] }
  0x17   :  { %184 = vmatpush.bf16.msra.mxu0 %v452_v3  ;;  %v444_v10 = vor.u32 %v534_v6, %v443_v5  ;;  %v448_v11 = vor.u32 %v533_v8, %v445_v9  ;;  %v435_v12 = vld [vmem:[#allocation5 + $0x50] sm:$0xf]  ;;  %v532_v13 = vld [vmem:[#allocation5 + $0x54] sm:$0xf0]  ;;  %v531_v14 = vld [vmem:[#allocation5 + $0x54] sm:$0xf] }
  0x18   :  { %197 = vmatpush.bf16.msra.mxu1 %v456_v7  ;;  %v437_v15 = vld [vmem:[#allocation5 + $0x58] sm:$0xf0]  ;;  %v436_v16 = vor.u32 %v532_v13, %v435_v12  ;;  %v427_v18 = vld [vmem:[#allocation5 + $0x40] sm:$0xf]  ;;  %v530_v19 = vld [vmem:[#allocation5 + $0x44] sm:$0xf0] }
  0x19   :  { %v440_v17 = vor.u32 %v531_v14, %v437_v15  ;;  %v529_v20 = vld [vmem:[#allocation5 + $0x44] sm:$0xf]  ;;  %v429_v21 = vld [vmem:[#allocation5 + $0x48] sm:$0xf0]  ;;  %v428_v22 = vor.u32 %v530_v19, %v427_v18  ;;  %v544_v23 = vld [vmem:[#allocation8 + $0x38] sm:$0xff]  ;;  %s701_s15 = smov [#allocation10]  }
  0x1a   :  { %v552_v24 = vld [vmem:[#allocation8 + $0x78] sm:$0xff]  ;;  %v432_v25 = vor.u32 %v529_v20, %v429_v21  ;;  %v419_v26 = vld [vmem:[#allocation5 + $0x30] sm:$0xf]  ;;  %v527_v28 = vld [vmem:[#allocation5 + $0x34] sm:$0xf]  ;;  %346 = vmatpush.bf16.msra.mxu2 %v544_v23  ;;  %s379_s16 = sshll.u32 %s701_s15, 4  ;;  %s380_s16 = int_to_ptr.vmem [resolvable:$true] %s379_s16 }
  0x1b   :  { %185 = vmatpush.bf16.msra.mxu0 %v444_v10  ;;  %v528_v27 = vld [vmem:[#allocation5 + $0x34] sm:$0xf0]  ;;  %v421_v29 = vld [vmem:[#allocation5 + $0x38] sm:$0xf0]  ;;  %359 = vmatpush.bf16.msra.mxu3 %v552_v24  ;;  %v411_v34 = vld [vmem:[#allocation5 + $0x20] sm:$0xf] }
  0x1c   :  { %198 = vmatpush.bf16.msra.mxu1 %v448_v11  ;;  %v543_v30 = vld [vmem:[#allocation8 + $0x30] sm:$0xff]  ;;  %v420_v32 = vor.u32 %v528_v27, %v419_v26  ;;  %v424_v33 = vor.u32 %v527_v28, %v421_v29  ;;  %v526_v35 = vld [vmem:[#allocation5 + $0x24] sm:$0xf0]  ;;  %v525_v36 = vld [vmem:[#allocation5 + $0x24] sm:$0xf]  ;;  %s381_s19 = sshll.u32 %s755_s5, 4  ;;  %s382_s19 = int_to_ptr.hbm [resolvable:$true] %s381_s19 }
  0x1d   :  { %v551_v31 = vld [vmem:[#allocation8 + $0x70] sm:$0xff]  ;;  %v413_v37 = vld [vmem:[#allocation5 + $0x28] sm:$0xf0]  ;;  %v412_v40 = vor.u32 %v526_v35, %v411_v34  ;;  %v405_v45 = vld [vmem:[#allocation5 + $0x18] sm:$0xf0] }
  0x1e   :  { %347 = vmatpush.bf16.msra.mxu2 %v543_v30  ;;  %v542_v38 = vld [vmem:[#allocation8 + $0x28] sm:$0xff]  ;;  %v416_v41 = vor.u32 %v525_v36, %v413_v37  ;;  %v524_v43 = vld [vmem:[#allocation5 + $0x14] sm:$0xf0]  ;;  %v523_v44 = vld [vmem:[#allocation5 + $0x14] sm:$0xf] }
  0x1f   :  { %186 = vmatpush.bf16.msra.mxu0 %v436_v16  ;;  %360 = vmatpush.bf16.msra.mxu3 %v551_v31  ;;  %v550_v39 = vld [vmem:[#allocation8 + $0x68] sm:$0xff]  ;;  %v541_v46 = vld [vmem:[#allocation8 + $0x20] sm:$0xff]  ;;  %v408_v49 = vor.u32 %v523_v44, %v405_v45  ;;  %v540_v54 = vld [vmem:[#allocation8 + $0x18] sm:$0xff] }
  0x20   :  { %199 = vmatpush.bf16.msra.mxu1 %v440_v17  ;;  %v403_v42 = vld [vmem:[#allocation5 + $0x10] sm:$0xf]  ;;  %v549_v47 = vld [vmem:[#allocation8 + $0x60] sm:$0xff]  ;;  %v397_v53 = vld [vmem:[#allocation5 + $0x8] sm:$0xf0] }
  0x21   :  { %v404_v48 = vor.u32 %v524_v43, %v403_v42  ;;  %v395_v50 = vld [vmem:[#allocation5] sm:$0xf]  ;;  %v522_v51 = vld [vmem:[#allocation5 + $0x4] sm:$0xf0]  ;;  %v521_v52 = vld [vmem:[#allocation5 + $0x4] sm:$0xf] }
  0x22   :  { %348 = vmatpush.bf16.msra.mxu2 %v542_v38  ;;  %v548_v55 = vld [vmem:[#allocation8 + $0x58] sm:$0xff]  ;;  %v396_v56 = vor.u32 %v522_v51, %v395_v50  ;;  %v400_v58 = vor.u32 %v521_v52, %v397_v53  ;;  %v539_v59 = vld [vmem:[#allocation8 + $0x10] sm:$0xff]  ;;  %v538_v62 = vld [vmem:[#allocation8 + $0x8] sm:$0xff] }
  0x23   :  { %187 = vmatpush.bf16.msra.mxu0 %v428_v22  ;;  %361 = vmatpush.bf16.msra.mxu3 %v550_v39  ;;  %v80_v57 = vld [vmem:[#allocation2] sm:$0xff]  ;;  %v546_v63 = vld [vmem:[#allocation8 + $0x48] sm:$0xff]  ;;  %v537_v0 = vld [vmem:[#allocation8] sm:$0xff] }
  0x24   :  { %200 = vmatpush.bf16.msra.mxu1 %v432_v25  ;;  %v547_v60 = vld [vmem:[#allocation8 + $0x50] sm:$0xff]  ;;  %v81_v61 = vpack.c.bf16 %v80_v57, %v80_v57  ;;  %v545_v1 = vld [vmem:[#allocation8 + $0x40] sm:$0xff]  ;;  %v98_v2 = vld [vmem:[#allocation7] sm:$0x3] }
  0x25   :  { %v100_v3 = vperm.slane %v98_v2, 0  ;;  %v101_v4 = vperm.slane %v98_v2, 1  ;;  %v562_v15 = vld [vmem:[%s754_s4] ss:$0 sm:$0xff] }
  0x26   :  { %349 = vmatpush.bf16.msra.mxu2 %v541_v46 }
  0x27   :  { %188 = vmatpush.bf16.msra.mxu0 %v420_v32  ;;  %362 = vmatpush.bf16.msra.mxu3 %v549_v47 }
  0x28   :  { %201 = vmatpush.bf16.msra.mxu1 %v424_v33 }
  0x2a   :  { %350 = vmatpush.bf16.msra.mxu2 %v540_v54 }
  0x2b   :  { %189 = vmatpush.bf16.msra.mxu0 %v412_v40  ;;  %363 = vmatpush.bf16.msra.mxu3 %v548_v55 }
  0x2c   :  { %202 = vmatpush.bf16.msra.mxu1 %v416_v41 }
  0x2e   :  { %351 = vmatpush.bf16.msra.mxu2 %v539_v59 }
  0x2f   :  { %190 = vmatpush.bf16.msra.mxu0 %v404_v48  ;;  %364 = vmatpush.bf16.msra.mxu3 %v547_v60 }
  0x30   :  { %203 = vmatpush.bf16.msra.mxu1 %v408_v49 }
  0x32   :  { %352 = vmatpush.bf16.msra.mxu2 %v538_v62 }
  0x33   :  { %191 = vmatpush.bf16.msra.mxu0 %v396_v56  ;;  %365 = vmatpush.bf16.msra.mxu3 %v546_v63 }
  0x34   :  { %204 = vmatpush.bf16.msra.mxu1 %v400_v58 }
  0x36   :  { %192 = vmatmul.bf16.vlgmr.msra.gmra.mxu0 %v81_v61  ;;  %353 = vmatpush.bf16.msra.mxu2 %v537_v0 }
  0x37   :  { %205 = vmatmul.bf16.vlgmr.msra.gmra.mxu1 %v81_v61  ;;  %366 = vmatpush.bf16.msra.mxu3 %v545_v1 }
  0xb3   :  { %v193_v5 = vpop.f32.mrf.mxu0 }
  0xb4   :  { %v194_v6 = vadd.f32 %v193_v5, %v100_v3  ;;  %v206_v7 = vpop.f32.mrf.mxu1 }
  0xb5   :  { %v207_v8 = vadd.f32 %v206_v7, %v101_v4 }
  0xb6   :  { %v210_v9 = vmax.f32 %v194_v6, 0.0 }
  0xb7   :  { %v211_v10 = vmax.f32 %v207_v8, 0.0 }
  0xb8   :  { %v212_v11 = vpack.c.bf16 %v210_v9, %v210_v9 }
  0xb9   :  { %v213_v12 = vpack.c.bf16 %v211_v10, %v211_v10 }
  0xba   :  { %354 = vmatmul.bf16.vlgmr.msra.gmra.mxu2 %v212_v11 }
  0xbb   :  { %367 = vmatmul.bf16.vlgmr.msra.gmra.mxu3 %v213_v12  ;;  %v195_v13 = vpop.f32.mrf.mxu0 }
  0xbc   :  { %v208_v14 = vpop.f32.mrf.mxu1 }
 0x13d   :  { %v355_v16 = vpop.f32.mrf.mxu2 }
 0x13e   :  { %v356_v17 = vadd.f32 %v562_v15, %v355_v16  ;;  %v368_v18 = vpop.f32.mrf.mxu3 }
 0x140   :  { %v369_v19 = vadd.f32 %v368_v18, %v356_v17 }
 0x142   :  { %563 = vtanh.f32 %v369_v19 }
 0x145   :  { %v357_v20 = vpop.f32.mrf.mxu2 }
 0x146   :  { %v370_v21 = vpop.f32.mrf.mxu3 }
 0x148   :  { %v564_v22 = vpop.eup %563 }
 0x149   :  { %373 = vst [vmem:[#allocation10] sm:$0xff] %v564_v22 }
 0x14a   :  { %384 = dma.vmem_to_hbm [thread:$0]  %s380_s16, 128, %s382_s19, [#allocation4]  }
 0x14b   :  { %691 = dma.done.wait [#allocation4], 128  }
 0x14c   :  { %692 = vsyncadd [#allocation4], 4294967168 }
 0x14d   :  { %389 = vsyncpa [#allocation3], 1 }
 0x14e   :  { %390 = vsyncpa [#allocation6], 1 }
 0x14f   :  { %391 = vsyncpa [#allocation9], 1 }
 0x150   :  { %392 = vsyncpa [#allocation4], 1 }

</bundles_post_ra>
